<compile_context>
chip_gen: v6e
topology: v6e:2x2x1
jax: 0.10.0
libtpu: 0.0.40
codegen_flags: <defaults>
</compile_context>

<pallas_src>
import math

import jax
import jax.numpy as jnp
from jax import lax
from jax.experimental import pallas as pl
from jax.experimental.pallas import tpu as pltpu


_C_PAD = 128  # lane-dense classifier output width


# ------------------------------ kernel -------------------------------------- #

def _layer_norm(y, w, b, eps=1e-5):
    mu = jnp.mean(y, axis=-1, keepdims=True)
    var = jnp.mean(jnp.square(y - mu), axis=-1, keepdims=True)
    return (y - mu) * lax.rsqrt(var + eps) * w + b


def transformer_kernel(x_ref, wqkv_ref, wo_ref, w1_ref, w2_ref, vec_ref,
                       fcw_ref, fcb_ref, o_ref, x_scr):
    """One grid step = (batch element b, transformer layer l)."""
    l = pl.program_id(1)
    n_layers = pl.num_programs(1)

    S, K = x_scr.shape
    H = wqkv_ref.shape[1]
    dk = wqkv_ref.shape[3] // 3
    d_ff = w1_ref.shape[-1]
    scale = 1.0 / math.sqrt(dk)

    # Load this batch element's activations into the carried scratch at layer 0.
    @pl.when(l == 0)
    def _():
        x_scr[...] = x_ref[0]

    x = x_scr[...]                                   # (S, K) float32
    vec = vec_ref[0]                                 # (VR, VW) float32 packed

    # ---- multi-headed self-attention (head = leading batch dim of einsums) ----
    x_b = jnp.broadcast_to(x.astype(jnp.bfloat16)[None], (H, S, K))
    qkv = jnp.einsum('hsk,hkd->hsd', x_b, wqkv_ref[0],
                     preferred_element_type=jnp.float32)         # (H, S, 3dk)
    qkv = qkv + vec[0:H, 0:3 * dk][:, None, :]
    q = qkv[..., 0:dk] * scale                       # fold 1/sqrt(d_k) into q
    k = qkv[..., dk:2 * dk]
    v = qkv[..., 2 * dk:3 * dk]

    s = jnp.einsum('hqd,hkd->hqk', q.astype(jnp.bfloat16),
                   k.astype(jnp.bfloat16),
                   preferred_element_type=jnp.float32)           # (H, S, S)
    s = s - jnp.max(s, axis=-1, keepdims=True)
    p = jnp.exp(s)
    p = p * pl.reciprocal(jnp.sum(p, axis=-1, keepdims=True), approx=True)
    ctx = jnp.einsum('hqk,hkd->hqd', p.astype(jnp.bfloat16),
                     v.astype(jnp.bfloat16),
                     preferred_element_type=jnp.float32)         # (H, S, dk)

    # Head merge fused into the output projection (no concat): per-head
    # batched matmul with Wo slices, then sum over heads (cheap VPU adds).
    attn_h = jnp.einsum('hsd,hdk->hsk', ctx.astype(jnp.bfloat16), wo_ref[0],
                        preferred_element_type=jnp.float32)      # (H, S, K)
    attn = attn_h[0]
    for h in range(1, H):
        attn = attn + attn_h[h]
    attn = attn + vec[H:H + 1, 0:K]

    x = _layer_norm(x + attn, vec[H + 1:H + 2, 0:K], vec[H + 2:H + 3, 0:K])

    # ---- feed-forward: Linear -> ReLU -> Linear ----
    h1 = jnp.dot(x.astype(jnp.bfloat16), w1_ref[0],
                 preferred_element_type=jnp.float32) + vec[H + 3:H + 4, 0:d_ff]
    h1 = jnp.maximum(h1, 0.0)
    ff = jnp.dot(h1.astype(jnp.bfloat16), w2_ref[0],
                 preferred_element_type=jnp.float32) + vec[H + 4:H + 5, 0:K]

    x = _layer_norm(x + ff, vec[H + 5:H + 6, 0:K], vec[H + 6:H + 7, 0:K])

    x_scr[...] = x

    # ---- classifier on the last layer only (lane-dense 128-wide store) ----
    @pl.when(l == n_layers - 1)
    def _():
        y = jnp.dot(x.astype(jnp.bfloat16), fcw_ref[...],
                    preferred_element_type=jnp.float32) + fcb_ref[...]
        o_ref[0] = y.astype(o_ref.dtype)


# ------------------------------ wrapper ------------------------------------- #

def transformer_forward(tokens, emb, pos_emb, block_params, fc_W, fc_b,
                        num_heads, num_classes):
    B, S = tokens.shape
    K = emb.shape[1]
    H = num_heads
    dk = K // H
    depth = len(block_params)
    d_ff = block_params[0][10].shape[1]              # W1: (K, d_ff)

    # Embedding + positional embedding gathers: plain JAX glue.
    x = emb[tokens] + pos_emb[jnp.arange(S)][None, :, :]          # (B, S, K)

    # ---- pack per-layer parameters, stacked over depth (streamed by grid) ----
    VW = -(-max(3 * dk, K, d_ff) // 128) * 128
    VR = -(-(H + 7) // 8) * 8

    wqkv_l, wo_l, w1_l, w2_l, vec_l = [], [], [], [], []
    for prm in block_params:
        (Wq, bq, Wk, bk, Wv, bv, Wo, bo, ln1w, ln1b,
         W1, b1, W2, b2, ln2w, ln2b) = prm
        # head-major QKV weights: (H, K, 3*dk)
        Wq_h = Wq.reshape(K, H, dk).transpose(1, 0, 2)
        Wk_h = Wk.reshape(K, H, dk).transpose(1, 0, 2)
        Wv_h = Wv.reshape(K, H, dk).transpose(1, 0, 2)
        wqkv_l.append(jnp.concatenate([Wq_h, Wk_h, Wv_h], axis=-1)
                      .astype(jnp.bfloat16))
        # head-major Wo: (H, dk, K)  (head-merge fused into the Wo einsum)
        wo_l.append(Wo.reshape(H, dk, K).astype(jnp.bfloat16))
        w1_l.append(W1.astype(jnp.bfloat16))
        w2_l.append(W2.astype(jnp.bfloat16))

        # pack all small vectors of this layer into one (VR, VW) f32 tile
        bqkv_h = jnp.concatenate([bq.reshape(H, dk), bk.reshape(H, dk),
                                  bv.reshape(H, dk)], axis=-1)     # (H, 3dk)
        vec = jnp.zeros((VR, VW), jnp.float32)
        vec = vec.at[0:H, 0:3 * dk].set(bqkv_h)
        vec = vec.at[H, 0:K].set(bo.reshape(K))
        vec = vec.at[H + 1, 0:K].set(ln1w.reshape(K))
        vec = vec.at[H + 2, 0:K].set(ln1b.reshape(K))
        vec = vec.at[H + 3, 0:d_ff].set(b1.reshape(d_ff))
        vec = vec.at[H + 4, 0:K].set(b2.reshape(K))
        vec = vec.at[H + 5, 0:K].set(ln2w.reshape(K))
        vec = vec.at[H + 6, 0:K].set(ln2b.reshape(K))
        vec_l.append(vec)

    wqkv_all = jnp.stack(wqkv_l)        # (depth, H, K, 3dk) bf16
    wo_all = jnp.stack(wo_l)            # (depth, H, dk, K)  bf16
    w1_all = jnp.stack(w1_l)            # (depth, K, d_ff)   bf16
    w2_all = jnp.stack(w2_l)            # (depth, d_ff, K)   bf16
    vec_all = jnp.stack(vec_l)          # (depth, VR, VW)    f32

    fcw_pad = jnp.zeros((K, _C_PAD), jnp.float32).at[:, :num_classes].set(fc_W)
    fcw_pad = fcw_pad.astype(jnp.bfloat16)
    fcb_pad = jnp.zeros((1, _C_PAD), jnp.float32).at[:, :num_classes].set(fc_b)

    # Advisory cost estimate for XLA scheduling around the fused call.
    flops = B * depth * (2 * S * K * 3 * K + 4 * H * S * S * dk
                         + 2 * S * K * K + 4 * S * K * d_ff) \
        + B * 2 * S * K * _C_PAD
    transcendentals = B * depth * H * S * S
    bytes_accessed = (x.size * 4 + B * S * _C_PAD * 4
                      + wqkv_all.size * 2 + wo_all.size * 2
                      + w1_all.size * 2 + w2_all.size * 2
                      + vec_all.size * 4 + fcw_pad.size * 2 + fcb_pad.size * 4)

    out = pl.pallas_call(
        transformer_kernel,
        out_shape=jax.ShapeDtypeStruct((B, S, _C_PAD), jnp.float32),
        grid=(B, depth),
        in_specs=[
            pl.BlockSpec((1, S, K), lambda b, l: (b, 0, 0)),             # x
            pl.BlockSpec((1, H, K, 3 * dk), lambda b, l: (l, 0, 0, 0)),  # Wqkv
            pl.BlockSpec((1, H, dk, K), lambda b, l: (l, 0, 0, 0)),      # Wo
            pl.BlockSpec((1, K, d_ff), lambda b, l: (l, 0, 0)),          # W1
            pl.BlockSpec((1, d_ff, K), lambda b, l: (l, 0, 0)),          # W2
            pl.BlockSpec((1, VR, VW), lambda b, l: (l, 0, 0)),           # vecs
            pl.BlockSpec((K, _C_PAD), lambda b, l: (0, 0)),              # fc W
            pl.BlockSpec((1, _C_PAD), lambda b, l: (0, 0)),              # fc b
        ],
        out_specs=pl.BlockSpec((1, S, _C_PAD), lambda b, l: (b, 0, 0)),
        scratch_shapes=[pltpu.VMEM((S, K), jnp.float32)],                # x carry
        compiler_params=pltpu.CompilerParams(
            dimension_semantics=("parallel", "arbitrary"),
            vmem_limit_bytes=32 * 1024 * 1024),
        cost_estimate=pl.CostEstimate(flops=flops,
                                      transcendentals=transcendentals,
                                      bytes_accessed=bytes_accessed),
    )(x, wqkv_all, wo_all, w1_all, w2_all, vec_all, fcw_pad, fcb_pad)

    return out[:, :, :num_classes]


# ------------------------------ params -------------------------------------- #

def init_linear(key, fan_in, fan_out):
    """PyTorch nn.Linear default: U(-1/sqrt(fan_in), 1/sqrt(fan_in))."""
    kw, kb = jax.random.split(key)
    bound = 1.0 / math.sqrt(fan_in)
    W = jax.random.uniform(kw, (fan_in, fan_out), jnp.float32, -bound, bound)
    b = jax.random.uniform(kb, (1, fan_out), jnp.float32, -bound, bound)
    return W, b


def init_block(key, k_model, d_ff):
    keys = jax.random.split(key, 6)
    Wq, bq = init_linear(keys[0], k_model, k_model)
    Wk, bk = init_linear(keys[1], k_model, k_model)
    Wv, bv = init_linear(keys[2], k_model, k_model)
    Wo, bo = init_linear(keys[3], k_model, k_model)
    ln1w = jnp.ones((1, k_model), jnp.float32)
    ln1b = jnp.zeros((1, k_model), jnp.float32)
    W1, b1 = init_linear(keys[4], k_model, d_ff)
    W2, b2 = init_linear(keys[5], d_ff, k_model)
    ln2w = jnp.ones((1, k_model), jnp.float32)
    ln2b = jnp.zeros((1, k_model), jnp.float32)
    return (Wq, bq, Wk, bk, Wv, bv, Wo, bo, ln1w, ln1b,
            W1, b1, W2, b2, ln2w, ln2b)


# ------------------------------ main ----------------------------------------- #

if __name__ == "__main__":
    # Transformer(k, heads, depth, seq_length, num_tokens, num_classes)
    K_MODEL = 32
    HEADS = 4
    DEPTH = 2
    SEQ_LEN = 8
    NUM_TOKENS = 50
    NUM_CLASSES = 10
    BATCH = 2

    root = jax.random.PRNGKey(0)
    k_tok, k_emb, k_pos, k_fc, *k_blocks = jax.random.split(root, 4 + DEPTH)

    tokens = jax.random.randint(k_tok, (BATCH, SEQ_LEN), 0, NUM_TOKENS,
                                dtype=jnp.int32)

    # nn.Embedding default init: N(0, 1)
    emb = jax.random.normal(k_emb, (NUM_TOKENS, K_MODEL), jnp.float32)
    pos_emb = jax.random.normal(k_pos, (SEQ_LEN, K_MODEL), jnp.float32)

    block_params = [init_block(k_blocks[i], K_MODEL, K_MODEL * 4)
                    for i in range(DEPTH)]
    fc_W, fc_b = init_linear(k_fc, K_MODEL, NUM_CLASSES)

    out = transformer_forward(tokens, emb, pos_emb, block_params,
                              fc_W, fc_b, HEADS, NUM_CLASSES)
    out = jax.block_until_ready(out)
    assert out.shape == (BATCH, SEQ_LEN, NUM_CLASSES)
    assert bool(jnp.all(jnp.isfinite(out)))
    print("KERNEL_OK")
</pallas_src>

<mosaic_0001>
module attributes {stable_mosaic.version = 11 : i64} {
  func.func @transformer_kernel(%arg0: i32, %arg1: i32, %arg2: memref<1x8x32xf32, #tpu.memory_space<vmem>>, %arg3: memref<1x4x32x24xbf16, #tpu.memory_space<vmem>>, %arg4: memref<1x4x8x32xbf16, #tpu.memory_space<vmem>>, %arg5: memref<1x32x128xbf16, #tpu.memory_space<vmem>>, %arg6: memref<1x128x32xbf16, #tpu.memory_space<vmem>>, %arg7: memref<1x16x128xf32, #tpu.memory_space<vmem>>, %arg8: memref<32x128xbf16, #tpu.memory_space<vmem>>, %arg9: memref<1x128xf32, #tpu.memory_space<vmem>>, %arg10: memref<1x8x128xf32, #tpu.memory_space<vmem>>, %arg11: memref<8x32xf32, #tpu.memory_space<vmem>>) attributes {dimension_semantics = [#tpu.dimension_semantics<parallel>, #tpu.dimension_semantics<arbitrary>], iteration_bounds = array<i64: 2, 2>, scalar_prefetch = 0 : i64, scratch_operands = 1 : i64, tpu.core_type = #tpu.core_type<tc>, window_params = [{transform_indices = @transform_0, window_bounds = array<i64: 1, 8, 32>}, {transform_indices = @transform_1, window_bounds = array<i64: 1, 4, 32, 24>}, {transform_indices = @transform_2, window_bounds = array<i64: 1, 4, 8, 32>}, {transform_indices = @transform_3, window_bounds = array<i64: 1, 32, 128>}, {transform_indices = @transform_4, window_bounds = array<i64: 1, 128, 32>}, {transform_indices = @transform_5, window_bounds = array<i64: 1, 16, 128>}, {pipeline_mode = #tpu.pipeline_mode<synchronous>, transform_indices = @transform_6, window_bounds = array<i64: 32, 128>}, {pipeline_mode = #tpu.pipeline_mode<synchronous>, transform_indices = @transform_7, window_bounds = array<i64: 1, 128>}, {transform_indices = @transform_8, window_bounds = array<i64: 1, 8, 128>}]} {
    %c0_i32 = arith.constant 0 : i32
    %0 = arith.cmpi eq, %arg1, %c0_i32 : i32
    %1 = arith.extui %0 : i1 to i32
    %c0_i32_0 = arith.constant 0 : i32
    %2 = arith.cmpi ne, %1, %c0_i32_0 : i32
    scf.if %2 {
      %c0_41 = arith.constant 0 : index
      %c0_42 = arith.constant 0 : index
      %c0_43 = arith.constant 0 : index
      %126 = vector.load %arg2[%c0_41, %c0_42, %c0_43] : memref<1x8x32xf32, #tpu.memory_space<vmem>>, vector<1x8x32xf32>
      %127 = vector.shape_cast %126 : vector<1x8x32xf32> to vector<8x32xf32>
      %c0_44 = arith.constant 0 : index
      %c0_45 = arith.constant 0 : index
      %128 = vector.load %arg11[%c0_44, %c0_45] : memref<8x32xf32, #tpu.memory_space<vmem>>, vector<8x32xf32>
      tpu.vector_store %arg11[%c0_44, %c0_45], %127 {strides = array<i32>} : memref<8x32xf32, #tpu.memory_space<vmem>>, vector<8x32xf32>,
    } else {
    }
    %c0 = arith.constant 0 : index
    %c0_1 = arith.constant 0 : index
    %3 = vector.load %arg11[%c0, %c0_1] : memref<8x32xf32, #tpu.memory_space<vmem>>, vector<8x32xf32>
    %c0_2 = arith.constant 0 : index
    %c0_3 = arith.constant 0 : index
    %c0_4 = arith.constant 0 : index
    %4 = vector.load %arg7[%c0_2, %c0_3, %c0_4] : memref<1x16x128xf32, #tpu.memory_space<vmem>>, vector<1x16x128xf32>
    %5 = vector.shape_cast %4 : vector<1x16x128xf32> to vector<16x128xf32>
    %6 = arith.truncf %3 : vector<8x32xf32> to vector<8x32xbf16>
    %7 = vector.shape_cast %6 : vector<8x32xbf16> to vector<1x8x32xbf16>
    %8 = vector.shape_cast %7 : vector<1x8x32xbf16> to vector<1x8x32xbf16>
    %9 = vector.broadcast %8 : vector<1x8x32xbf16> to vector<4x8x32xbf16>
    %c0_5 = arith.constant 0 : index
    %c0_6 = arith.constant 0 : index
    %c0_7 = arith.constant 0 : index
    %c0_8 = arith.constant 0 : index
    %10 = vector.load %arg3[%c0_5, %c0_6, %c0_7, %c0_8] : memref<1x4x32x24xbf16, #tpu.memory_space<vmem>>, vector<1x4x32x24xbf16>
    %11 = vector.shape_cast %10 : vector<1x4x32x24xbf16> to vector<4x32x24xbf16>
    "tpu.trace_start"() <{level = 10 : i32, message = "hsk,hkd->hsd"}> : () -> ()
    %cst = arith.constant dense<0.000000e+00> : vector<4x8x24xf32>
    %12 = tpu.matmul %9, %11, %cst {dimension_numbers = #tpu.dot_dimension_numbers<[2], [1], [1], [2], [0, 0, 0, 1, 1, 2], [0], [0]>} : vector<4x8x32xbf16>, vector<4x32x24xbf16>, vector<4x8x24xf32> -> vector<4x8x24xf32>
    "tpu.trace_stop"() : () -> ()
    %13 = vector.extract_strided_slice %5 {offsets = [0, 0], sizes = [4, 24], strides = [1, 1]} : vector<16x128xf32> to vector<4x24xf32>
    %14 = vector.shape_cast %13 : vector<4x24xf32> to vector<4x1x24xf32>
    %15 = vector.broadcast %14 : vector<4x1x24xf32> to vector<4x8x24xf32>
    %16 = arith.addf %12, %15 : vector<4x8x24xf32>
    %17 = vector.extract_strided_slice %16 {offsets = [0, 0, 0], sizes = [4, 8, 8], strides = [1, 1, 1]} : vector<4x8x24xf32> to vector<4x8x8xf32>
    %cst_9 = arith.constant 0.353553385 : f32
    %18 = vector.broadcast %cst_9 : f32 to vector<4x8x8xf32>
    %19 = arith.mulf %17, %18 : vector<4x8x8xf32>
    %20 = vector.extract_strided_slice %16 {offsets = [0, 0, 8], sizes = [4, 8, 8], strides = [1, 1, 1]} : vector<4x8x24xf32> to vector<4x8x8xf32>
    %21 = vector.extract_strided_slice %16 {offsets = [0, 0, 16], sizes = [4, 8, 8], strides = [1, 1, 1]} : vector<4x8x24xf32> to vector<4x8x8xf32>
    %22 = arith.truncf %19 : vector<4x8x8xf32> to vector<4x8x8xbf16>
    %23 = arith.truncf %20 : vector<4x8x8xf32> to vector<4x8x8xbf16>
    "tpu.trace_start"() <{level = 10 : i32, message = "hqd,hkd->hqk"}> : () -> ()
    %cst_10 = arith.constant dense<0.000000e+00> : vector<4x8x8xf32>
    %24 = tpu.matmul %22, %23, %cst_10 {dimension_numbers = #tpu.dot_dimension_numbers<[2], [2], [1], [1], [0, 0, 0, 1, 1, 1], [0], [0]>} : vector<4x8x8xbf16>, vector<4x8x8xbf16>, vector<4x8x8xf32> -> vector<4x8x8xf32>
    "tpu.trace_stop"() : () -> ()
    %cst_11 = arith.constant dense<0xFF800000> : vector<4x8xf32>
    %25 = vector.multi_reduction <maximumf>, %24, %cst_11 [2] : vector<4x8x8xf32> to vector<4x8xf32>
    %26 = vector.shape_cast %25 : vector<4x8xf32> to vector<4x8x1xf32>
    %27 = vector.broadcast %26 : vector<4x8x1xf32> to vector<4x8x8xf32>
    %28 = arith.subf %24, %27 : vector<4x8x8xf32>
    %29 = math.exp %28 : vector<4x8x8xf32>
    %cst_12 = arith.constant dense<0.000000e+00> : vector<4x8xf32>
    %30 = vector.multi_reduction <add>, %29, %cst_12 [2] : vector<4x8x8xf32> to vector<4x8xf32>
    %31 = vector.shape_cast %30 : vector<4x8xf32> to vector<4x8x1xf32>
    %32 = tpu.reciprocal %31 {approx = true} : vector<4x8x1xf32> -> vector<4x8x1xf32>
    %33 = vector.broadcast %32 : vector<4x8x1xf32> to vector<4x8x8xf32>
    %34 = arith.mulf %29, %33 : vector<4x8x8xf32>
    %35 = arith.truncf %34 : vector<4x8x8xf32> to vector<4x8x8xbf16>
    %36 = arith.truncf %21 : vector<4x8x8xf32> to vector<4x8x8xbf16>
    "tpu.trace_start"() <{level = 10 : i32, message = "hqk,hkd->hqd"}> : () -> ()
    %cst_13 = arith.constant dense<0.000000e+00> : vector<4x8x8xf32>
    %37 = tpu.matmul %35, %36, %cst_13 {dimension_numbers = #tpu.dot_dimension_numbers<[2], [1], [1], [2], [0, 0, 0, 1, 1, 2], [0], [0]>} : vector<4x8x8xbf16>, vector<4x8x8xbf16>, vector<4x8x8xf32> -> vector<4x8x8xf32>
    "tpu.trace_stop"() : () -> ()
    %38 = arith.truncf %37 : vector<4x8x8xf32> to vector<4x8x8xbf16>
    %c0_14 = arith.constant 0 : index
    %c0_15 = arith.constant 0 : index
    %c0_16 = arith.constant 0 : index
    %c0_17 = arith.constant 0 : index
    %39 = vector.load %arg4[%c0_14, %c0_15, %c0_16, %c0_17] : memref<1x4x8x32xbf16, #tpu.memory_space<vmem>>, vector<1x4x8x32xbf16>
    %40 = vector.shape_cast %39 : vector<1x4x8x32xbf16> to vector<4x8x32xbf16>
    "tpu.trace_start"() <{level = 10 : i32, message = "hsd,hdk->hsk"}> : () -> ()
    %cst_18 = arith.constant dense<0.000000e+00> : vector<4x8x32xf32>
    %41 = tpu.matmul %38, %40, %cst_18 {dimension_numbers = #tpu.dot_dimension_numbers<[2], [1], [1], [2], [0, 0, 0, 1, 1, 2], [0], [0]>} : vector<4x8x8xbf16>, vector<4x8x32xbf16>, vector<4x8x32xf32> -> vector<4x8x32xf32>
    "tpu.trace_stop"() : () -> ()
    %42 = vector.extract_strided_slice %41 {offsets = [0, 0, 0], sizes = [1, 8, 32], strides = [1, 1, 1]} : vector<4x8x32xf32> to vector<1x8x32xf32>
    %43 = vector.shape_cast %42 : vector<1x8x32xf32> to vector<8x32xf32>
    %44 = vector.extract_strided_slice %41 {offsets = [1, 0, 0], sizes = [1, 8, 32], strides = [1, 1, 1]} : vector<4x8x32xf32> to vector<1x8x32xf32>
    %45 = vector.shape_cast %44 : vector<1x8x32xf32> to vector<8x32xf32>
    %46 = arith.addf %43, %45 : vector<8x32xf32>
    %47 = vector.extract_strided_slice %41 {offsets = [2, 0, 0], sizes = [1, 8, 32], strides = [1, 1, 1]} : vector<4x8x32xf32> to vector<1x8x32xf32>
    %48 = vector.shape_cast %47 : vector<1x8x32xf32> to vector<8x32xf32>
    %49 = arith.addf %46, %48 : vector<8x32xf32>
    %50 = vector.extract_strided_slice %41 {offsets = [3, 0, 0], sizes = [1, 8, 32], strides = [1, 1, 1]} : vector<4x8x32xf32> to vector<1x8x32xf32>
    %51 = vector.shape_cast %50 : vector<1x8x32xf32> to vector<8x32xf32>
    %52 = arith.addf %49, %51 : vector<8x32xf32>
    %53 = vector.extract_strided_slice %5 {offsets = [4, 0], sizes = [1, 32], strides = [1, 1]} : vector<16x128xf32> to vector<1x32xf32>
    %54 = vector.broadcast %53 : vector<1x32xf32> to vector<8x32xf32>
    %55 = arith.addf %52, %54 : vector<8x32xf32>
    %56 = arith.addf %3, %55 : vector<8x32xf32>
    %57 = vector.extract_strided_slice %5 {offsets = [5, 0], sizes = [1, 32], strides = [1, 1]} : vector<16x128xf32> to vector<1x32xf32>
    %58 = vector.extract_strided_slice %5 {offsets = [6, 0], sizes = [1, 32], strides = [1, 1]} : vector<16x128xf32> to vector<1x32xf32>
    %cst_19 = arith.constant dense<0.000000e+00> : vector<8xf32>
    %59 = vector.multi_reduction <add>, %56, %cst_19 [1] : vector<8x32xf32> to vector<8xf32>
    %60 = vector.shape_cast %59 : vector<8xf32> to vector<8x1xf32>
    %cst_20 = arith.constant 3.200000e+01 : f32
    %61 = vector.broadcast %cst_20 : f32 to vector<8x1xf32>
    %62 = arith.divf %60, %61 : vector<8x1xf32>
    %63 = vector.broadcast %62 : vector<8x1xf32> to vector<8x32xf32>
    %64 = arith.subf %56, %63 : vector<8x32xf32>
    %65 = arith.mulf %64, %64 : vector<8x32xf32>
    %cst_21 = arith.constant dense<0.000000e+00> : vector<8xf32>
    %66 = vector.multi_reduction <add>, %65, %cst_21 [1] : vector<8x32xf32> to vector<8xf32>
    %67 = vector.shape_cast %66 : vector<8xf32> to vector<8x1xf32>
    %cst_22 = arith.constant 3.200000e+01 : f32
    %68 = vector.broadcast %cst_22 : f32 to vector<8x1xf32>
    %69 = arith.divf %67, %68 : vector<8x1xf32>
    %70 = vector.broadcast %62 : vector<8x1xf32> to vector<8x32xf32>
    %71 = arith.subf %56, %70 : vector<8x32xf32>
    %cst_23 = arith.constant 9.99999974E-6 : f32
    %72 = vector.broadcast %cst_23 : f32 to vector<8x1xf32>
    %73 = arith.addf %69, %72 : vector<8x1xf32>
    %74 = math.rsqrt %73 : vector<8x1xf32>
    %75 = vector.broadcast %74 : vector<8x1xf32> to vector<8x32xf32>
    %76 = arith.mulf %71, %75 : vector<8x32xf32>
    %77 = vector.broadcast %57 : vector<1x32xf32> to vector<8x32xf32>
    %78 = arith.mulf %76, %77 : vector<8x32xf32>
    %79 = vector.broadcast %58 : vector<1x32xf32> to vector<8x32xf32>
    %80 = arith.addf %78, %79 : vector<8x32xf32>
    %81 = arith.truncf %80 : vector<8x32xf32> to vector<8x32xbf16>
    %c0_24 = arith.constant 0 : index
    %c0_25 = arith.constant 0 : index
    %c0_26 = arith.constant 0 : index
    %82 = vector.load %arg5[%c0_24, %c0_25, %c0_26] : memref<1x32x128xbf16, #tpu.memory_space<vmem>>, vector<1x32x128xbf16>
    %83 = vector.shape_cast %82 : vector<1x32x128xbf16> to vector<32x128xbf16>
    %cst_27 = arith.constant dense<0.000000e+00> : vector<8x128xf32>
    %84 = tpu.matmul %81, %83, %cst_27 {dimension_numbers = #tpu.dot_dimension_numbers<[1], [0], [0], [1], [0, 0, 1, 1], [], []>} : vector<8x32xbf16>, vector<32x128xbf16>, vector<8x128xf32> -> vector<8x128xf32>
    %85 = vector.extract_strided_slice %5 {offsets = [7, 0], sizes = [1, 128], strides = [1, 1]} : vector<16x128xf32> to vector<1x128xf32>
    %86 = vector.broadcast %85 : vector<1x128xf32> to vector<8x128xf32>
    %87 = arith.addf %84, %86 : vector<8x128xf32>
    %cst_28 = arith.constant 0.000000e+00 : f32
    %88 = vector.broadcast %cst_28 : f32 to vector<8x128xf32>
    %89 = arith.maximumf %87, %88 : vector<8x128xf32>
    %90 = arith.truncf %89 : vector<8x128xf32> to vector<8x128xbf16>
    %c0_29 = arith.constant 0 : index
    %c0_30 = arith.constant 0 : index
    %c0_31 = arith.constant 0 : index
    %91 = vector.load %arg6[%c0_29, %c0_30, %c0_31] : memref<1x128x32xbf16, #tpu.memory_space<vmem>>, vector<1x128x32xbf16>
    %92 = vector.shape_cast %91 : vector<1x128x32xbf16> to vector<128x32xbf16>
    %cst_32 = arith.constant dense<0.000000e+00> : vector<8x32xf32>
    %93 = tpu.matmul %90, %92, %cst_32 {dimension_numbers = #tpu.dot_dimension_numbers<[1], [0], [0], [1], [0, 0, 1, 1], [], []>} : vector<8x128xbf16>, vector<128x32xbf16>, vector<8x32xf32> -> vector<8x32xf32>
    %94 = vector.extract_strided_slice %5 {offsets = [8, 0], sizes = [1, 32], strides = [1, 1]} : vector<16x128xf32> to vector<1x32xf32>
    %95 = vector.broadcast %94 : vector<1x32xf32> to vector<8x32xf32>
    %96 = arith.addf %93, %95 : vector<8x32xf32>
    %97 = arith.addf %80, %96 : vector<8x32xf32>
    %98 = vector.extract_strided_slice %5 {offsets = [9, 0], sizes = [1, 32], strides = [1, 1]} : vector<16x128xf32> to vector<1x32xf32>
    %99 = vector.extract_strided_slice %5 {offsets = [10, 0], sizes = [1, 32], strides = [1, 1]} : vector<16x128xf32> to vector<1x32xf32>
    %cst_33 = arith.constant dense<0.000000e+00> : vector<8xf32>
    %100 = vector.multi_reduction <add>, %97, %cst_33 [1] : vector<8x32xf32> to vector<8xf32>
    %101 = vector.shape_cast %100 : vector<8xf32> to vector<8x1xf32>
    %cst_34 = arith.constant 3.200000e+01 : f32
    %102 = vector.broadcast %cst_34 : f32 to vector<8x1xf32>
    %103 = arith.divf %101, %102 : vector<8x1xf32>
    %104 = vector.broadcast %103 : vector<8x1xf32> to vector<8x32xf32>
    %105 = arith.subf %97, %104 : vector<8x32xf32>
    %106 = arith.mulf %105, %105 : vector<8x32xf32>
    %cst_35 = arith.constant dense<0.000000e+00> : vector<8xf32>
    %107 = vector.multi_reduction <add>, %106, %cst_35 [1] : vector<8x32xf32> to vector<8xf32>
    %108 = vector.shape_cast %107 : vector<8xf32> to vector<8x1xf32>
    %cst_36 = arith.constant 3.200000e+01 : f32
    %109 = vector.broadcast %cst_36 : f32 to vector<8x1xf32>
    %110 = arith.divf %108, %109 : vector<8x1xf32>
    %111 = vector.broadcast %103 : vector<8x1xf32> to vector<8x32xf32>
    %112 = arith.subf %97, %111 : vector<8x32xf32>
    %cst_37 = arith.constant 9.99999974E-6 : f32
    %113 = vector.broadcast %cst_37 : f32 to vector<8x1xf32>
    %114 = arith.addf %110, %113 : vector<8x1xf32>
    %115 = math.rsqrt %114 : vector<8x1xf32>
    %116 = vector.broadcast %115 : vector<8x1xf32> to vector<8x32xf32>
    %117 = arith.mulf %112, %116 : vector<8x32xf32>
    %118 = vector.broadcast %98 : vector<1x32xf32> to vector<8x32xf32>
    %119 = arith.mulf %117, %118 : vector<8x32xf32>
    %120 = vector.broadcast %99 : vector<1x32xf32> to vector<8x32xf32>
    %121 = arith.addf %119, %120 : vector<8x32xf32>
    %c0_38 = arith.constant 0 : index
    %c0_39 = arith.constant 0 : index
    %122 = vector.load %arg11[%c0_38, %c0_39] : memref<8x32xf32, #tpu.memory_space<vmem>>, vector<8x32xf32>
    tpu.vector_store %arg11[%c0_38, %c0_39], %121 {strides = array<i32>} : memref<8x32xf32, #tpu.memory_space<vmem>>, vector<8x32xf32>,
    %c1_i32 = arith.constant 1 : i32
    %123 = arith.cmpi eq, %arg1, %c1_i32 : i32
    %124 = arith.extui %123 : i1 to i32
    %c0_i32_40 = arith.constant 0 : i32
    %125 = arith.cmpi ne, %124, %c0_i32_40 : i32
    scf.if %125 {
      %126 = arith.truncf %121 : vector<8x32xf32> to vector<8x32xbf16>
      %c0_41 = arith.constant 0 : index
      %c0_42 = arith.constant 0 : index
      %127 = vector.load %arg8[%c0_41, %c0_42] : memref<32x128xbf16, #tpu.memory_space<vmem>>, vector<32x128xbf16>
      %cst_43 = arith.constant dense<0.000000e+00> : vector<8x128xf32>
      %128 = tpu.matmul %126, %127, %cst_43 {dimension_numbers = #tpu.dot_dimension_numbers<[1], [0], [0], [1], [0, 0, 1, 1], [], []>} : vector<8x32xbf16>, vector<32x128xbf16>, vector<8x128xf32> -> vector<8x128xf32>
      %c0_44 = arith.constant 0 : index
      %c0_45 = arith.constant 0 : index
      %129 = vector.load %arg9[%c0_44, %c0_45] : memref<1x128xf32, #tpu.memory_space<vmem>>, vector<1x128xf32>
      %130 = vector.broadcast %129 : vector<1x128xf32> to vector<8x128xf32>
      %131 = arith.addf %128, %130 : vector<8x128xf32>
      %c0_46 = arith.constant 0 : index
      %c0_47 = arith.constant 0 : index
      %c0_48 = arith.constant 0 : index
      %132 = vector.load %arg10[%c0_46, %c0_47, %c0_48] : memref<1x8x128xf32, #tpu.memory_space<vmem>>, vector<1x8x128xf32>
      %133 = vector.shape_cast %132 : vector<1x8x128xf32> to vector<8x128xf32>
      %134 = vector.shape_cast %131 : vector<8x128xf32> to vector<1x8x128xf32>
      tpu.vector_store %arg10[%c0_46, %c0_47, %c0_48], %134 {strides = array<i32>} : memref<1x8x128xf32, #tpu.memory_space<vmem>>, vector<1x8x128xf32>,
    } else {
    }
    return
  }
  func.func @transform_0(%arg0: i32, %arg1: i32) -> (i32, i32, i32) {
    %c0_i32 = arith.constant 0 : i32
    %c0_i32_0 = arith.constant 0 : i32
    %c0_i32_1 = arith.constant 0 : i32
    return %arg0, %c0_i32, %c0_i32_0 : i32, i32, i32
  }
  func.func @transform_1(%arg0: i32, %arg1: i32) -> (i32, i32, i32, i32) {
    %c0_i32 = arith.constant 0 : i32
    %c0_i32_0 = arith.constant 0 : i32
    %c0_i32_1 = arith.constant 0 : i32
    %c0_i32_2 = arith.constant 0 : i32
    return %arg1, %c0_i32, %c0_i32_0, %c0_i32_1 : i32, i32, i32, i32
  }
  func.func @transform_2(%arg0: i32, %arg1: i32) -> (i32, i32, i32, i32) {
    %c0_i32 = arith.constant 0 : i32
    %c0_i32_0 = arith.constant 0 : i32
    %c0_i32_1 = arith.constant 0 : i32
    %c0_i32_2 = arith.constant 0 : i32
    return %arg1, %c0_i32, %c0_i32_0, %c0_i32_1 : i32, i32, i32, i32
  }
  func.func @transform_3(%arg0: i32, %arg1: i32) -> (i32, i32, i32) {
    %c0_i32 = arith.constant 0 : i32
    %c0_i32_0 = arith.constant 0 : i32
    %c0_i32_1 = arith.constant 0 : i32
    return %arg1, %c0_i32, %c0_i32_0 : i32, i32, i32
  }
  func.func @transform_4(%arg0: i32, %arg1: i32) -> (i32, i32, i32) {
    %c0_i32 = arith.constant 0 : i32
    %c0_i32_0 = arith.constant 0 : i32
    %c0_i32_1 = arith.constant 0 : i32
    return %arg1, %c0_i32, %c0_i32_0 : i32, i32, i32
  }
  func.func @transform_5(%arg0: i32, %arg1: i32) -> (i32, i32, i32) {
    %c0_i32 = arith.constant 0 : i32
    %c0_i32_0 = arith.constant 0 : i32
    %c0_i32_1 = arith.constant 0 : i32
    return %arg1, %c0_i32, %c0_i32_0 : i32, i32, i32
  }
  func.func @transform_6(%arg0: i32, %arg1: i32) -> (i32, i32) {
    %c0_i32 = arith.constant 0 : i32
    %c0_i32_0 = arith.constant 0 : i32
    %c0_i32_1 = arith.constant 0 : i32
    return %c0_i32, %c0_i32_0 : i32, i32
  }
  func.func @transform_7(%arg0: i32, %arg1: i32) -> (i32, i32) {
    %c0_i32 = arith.constant 0 : i32
    %c0_i32_0 = arith.constant 0 : i32
    %c0_i32_1 = arith.constant 0 : i32
    return %c0_i32, %c0_i32_0 : i32, i32
  }
  func.func @transform_8(%arg0: i32, %arg1: i32) -> (i32, i32, i32) {
    %c0_i32 = arith.constant 0 : i32
    %c0_i32_0 = arith.constant 0 : i32
    %c0_i32_1 = arith.constant 0 : i32
    return %arg0, %c0_i32, %c0_i32_0 : i32, i32, i32
  }
}

</mosaic_0001>

<bundles_post_ra>
// kernel: tpu_custom_call.1
= control target key start
LH: loop header
LB: loop body
LE: loop exit
PB: predicated region body
PF: predicated region fallthrough
CT: control target
= control target key end

     0   :  { %13 = vsyncpa [#allocation4], 0  ;;  %s2661_s0 = inlined_call_operand.vmem [shape: f32[2,8,32], index: 0, kind: input, shape index: {}]   ;;  %s2662_s1 = inlined_call_operand.vmem [shape: bf16[2,4,32,24], index: 1, kind: input, shape index: {}]   ;;  %s2663_s2 = inlined_call_operand.vmem [shape: bf16[2,4,8,32], index: 2, kind: input, shape index: {}]   ;;  %s2664_s3 = inlined_call_operand.vmem [shape: bf16[2,32,128], index: 3, kind: input, shape index: {}]   ;;  %s2665_s4 = inlined_call_operand.vmem [shape: bf16[2,128,32], index: 4, kind: input, shape index: {}]   ;;  %s2666_s5 = inlined_call_operand.vmem [shape: f32[2,16,128], index: 5, kind: input, shape index: {}]   ;;  %s2667_s6 = inlined_call_operand.vmem [shape: bf16[32,128], index: 6, kind: input, shape index: {}]   ;;  %s2668_s7 = inlined_call_operand.vmem [shape: f32[1,128], index: 7, kind: input, shape index: {}]   ;;  %s2669_s8 = inlined_call_operand.hbm [shape: f32[2,8,128], index: 8, kind: output, shape index: {}]  }
   0x1   :  { %15 = vsyncpa [#allocation4 + $0x1], 0  ;;  %s2311_s27 = smov 0   ;;  %s2313_s28 = smov 0  }
   0x2   :  { %s2315_s29 = smov 0   ;;  %s2317_s30 = smov 0  }
   0x3   :  { %s2319_s9 = smov 0   ;;  %s2321_s10 = smov 0  }
   0x4   :  { %s2323_s11 = smov 0   ;;  %s2325_s12 = smov 0  }
   0x5 LB: > { %2679 = sst [smem:[#allocation6_spill]] %s2228_s27  ;;  %s1788_s13 = sadd.s32 4294967295, %s2256_s12   ;;  %s2256_s12 = sphi %s2325_s12, %s21_s12   ;;  %s2252_s11 = sphi %s2323_s11, %s2699_s11   ;;  %s2248_s10 = sphi %s2321_s10, %s2698_s10   ;;  %s2244_s9 = sphi %s2319_s9, %s2697_s9   ;;  %s2240_s30 = sphi %s2317_s30, %s2696_s30   ;;  %s2236_s29 = sphi %s2315_s29, %s2695_s29   ;;  %s2232_s28 = sphi %s2313_s28, %s2701_s28   ;;  %s2228_s27 = sphi %s2311_s27, %s2700_s27  }
   0x6   : > { %2680 = sst [smem:[#allocation7_spill]] %s2236_s29  ;;  %s1789_s14 = sadd.s32 4294967294, %s2256_s12  }
   0x7   : > { %2681 = sst [smem:[#allocation8_spill]] %s2248_s10  ;;  %s30_s15 = sadd.s32 1, %s2248_s10 }
   0x8   : > { %2682 = sst [smem:[#allocation9_spill]] %s2252_s11  ;;  %p31_p0 = scmp.ge.s32.totalorder %s30_s15, 2 }
   0x9   : > { %2683 = sst [smem:[#allocation10_spill]] %s2256_s12  ;;  %s33_s16 = sadd.s32 1, %s2252_s11 }
   0xa   : > { %p248_p1 = scmp.ne.s32.totalorder %s2236_s29, %s2232_s28  ;;  %p249_p2 = scmp.eq.s32.totalorder %s1788_s13, 3 }
   0xb   : > { %s2703_s15 = smov (%p31_p0, %s30_s15), 0  ;;  %s2705_s16 = smov (!%p31_p0, %s33_s16), %s2252_s11 }
   0xc   : > { %2684 = sst [smem:[#allocation11_spill]] %s2703_s15  ;;  %p2360_p3 = por %p249_p2, %p248_p1 }
   0xd   : > { %p254_p4 = scmp.ne.s32.totalorder %s2232_s28, %s2228_s27  ;;  %p35_p5 = scmp.ge.s32.totalorder %s2705_s16, 2 }
   0xe   : > { %p255_p6 = scmp.eq.s32.totalorder %s1789_s14, 3  ;;  %p1792_p7 = scmp.ge.s32.totalorder %s2256_s12, 1 }
   0xf   : > { %p326_p8 = scmp.lt.s32.totalorder %s2256_s12, 5  ;;  %s2707_s16 = smov (%p35_p5, %s2705_s16), 0 }
  0x10   : > { %2686 = sst [smem:[#allocation12_spill]] %s2707_s16  ;;  %p2370_p9 = por %p255_p6, %p254_p4 }
  0x11   : > { %p327_p10 = pnand %p1792_p7, %p326_p8  ;;  %s235_s19 = ssub.s32 %s2252_s11, %s2707_s16 }
  0x12   : > { %s2687_s18 = scalar_select %p2370_p9, 1, 0 }
  0x13   : > { %s238_s20 = sadd.s32 1, %s2236_s29  ;;  %p236_p11 = scmp.eq.s32.totalorder %s235_s19, 0 }
  0x14   : > { %2688 = sst [smem:[#allocation13_spill]] %s2687_s18  ;;  %330 = sbr.rel (%p327_p10) target bundleno = 2536 (0x9e8), region = 52 }
  0x15   : > { %s2378_s21 = scalar_select %p236_p11, %s2236_s29, %s238_s20  }
  0x16   : > { %s2674_s22 = sand.u32 (!%p327_p10), 1, %s2232_s28   ;;  %p384_p12 = scmp.lt.s32.totalorder (!%p327_p10), %s2244_s9, 1 }
  0x17   : > { %2689 = sst [smem:[#allocation14_spill]] %s2378_s21  ;;  %s2384_s23 = sshll.u32 (!%p327_p10), %s2674_s22, 3 }
  0x18   : > { %p388_p13 = scmp.lt.s32.totalorder (!%p327_p10), %s2240_s30, 1  ;;  %p1805_p0 = scmp.ne.s32.totalorder (!%p327_p10), %s2240_s30, 0 }
  0x19   : > { %s385_s24 = scalar_select %p384_p12, %s2244_s9, 1 }
  0x1a   : > { %s389_s25 = scalar_select %p388_p13, %s2240_s30, 1 }
  0x1b   : > { %s1794_s26 = sshll.u32 %s385_s24, 3 }
  0x1c   : > { %s387_s19 = scalar_lea.vmem %s2661_s0, %s1794_s26  ;;  %s1850_s20 = sshll.u32 %s389_s25, 6 }
  0x1d   : > { %s2395_s11 = scalar_lea.vmem %s2662_s1, %s1850_s20  ;;  %s1851_s10 = sshll.u32 %s389_s25, 4 }
  0x1e   : > { %s2400_s22 = scalar_lea.vmem %s2663_s2, %s1851_s10  ;;  %s2405_s24 = scalar_lea.vmem %s2664_s3, %s1851_s10 }
  0x1f   : > { %s2410_s26 = scalar_lea.vmem %s2665_s4, %s1850_s20  ;;  %s2415_s16 = scalar_lea.vmem %s2666_s5, %s1851_s10 }
  0x20   : > { %s383_s25 = scalar_lea.vmem [#allocation3], %s2384_s23  ;;  %417 = sbr.rel (%p1805_p0) target bundleno = 39 (0x27), region = 56 }
  0x25   : > { %v418_v0 = vld [vmem:[%s387_s19] sm:$0xff]  ;;  %vm419_vm0 = vcmask 261120  }
  0x26   : > { %420 = vst.msk [vmem:[#allocation2] sm:$0xff] %vm419_vm0, %v418_v0 }
  0x27 PF: > { %v2124_v1 = vld [vmem:[%s2395_s11 + $0x8] sm:$0xff]   ;;  %v2258_v2 = vmov 0.0   ;;  %v2125_v3 = vld [vmem:[%s2395_s11] sm:$0xff]   ;;  %vm2259_vm1 = vmmov 0   ;;  %v2128_v6 = vld [vmem:[%s2395_s11 + $0x38] sm:$0xff]   ;;  %vm498_vm2 = vcmask 261120   ;;  %v445_v14 = vlaneseq }
  0x28   : > { %1906 = vmatprep.subr.bf16.mxu0 %v2258_v2  ;;  %1930 = vmatprep.subr.bf16.mxu1 %v2258_v2  ;;  %v2126_v7 = vld [vmem:[%s2395_s11 + $0x18] sm:$0xff]   ;;  %v2130_v8 = vld [vmem:[%s2395_s11 + $0x30] sm:$0xff]   ;;  %v2129_v10 = vld [vmem:[%s2395_s11 + $0x28] sm:$0xff]   ;;  %v2260_v12 = vmov 1966171168   ;;  %s2261_s27 = smov 120  }
  0x29   : > { %1907 = vmatpush3.bf16.msra.mxu0 %v2124_v1  ;;  %1910 = vmatprep.mubr.msk.bf16.mxu0 %vm2259_vm1, %v2258_v2  ;;  %v2127_v9 = vld [vmem:[%s2395_s11 + $0x10] sm:$0xff]   ;;  %v2131_v11 = vld [vmem:[%s2395_s11 + $0x20] sm:$0xff]   ;;  %v443_v13 = vunpack.c.l.s4 %v2260_v12  ;;  %v2457_v16 = vshrl.u32 %v445_v14, 7  ;;  %vm713_vm3 = vcmask 64512   ;;  %s2262_s29 = smov 112   ;;  %vm960_vm4 = vcmask 1043456  }
  0x2a   : > { %1908 = vmatprep.subr.bf16.mxu0 %v2258_v2  ;;  %1934 = vmatprep.mubr.msk.bf16.mxu1 %vm2259_vm1, %v2258_v2  ;;  %v2461_v18 = vld [vmem:[%s2415_s16] sm:$0xff]  ;;  %p1841_p1 = scmp.ne.s32.totalorder %s2240_s30, 1 }
  0x2b   : > { %1931 = vmatpush3.bf16.msra.mxu1 %v2128_v6  ;;  %v444_v15 = vunpack.c.0.s8 %v443_v13  ;;  %v2465_v21 = vsub.s32 0, %v2457_v16 }
  0x2c   : > { %1932 = vmatprep.subr.bf16.mxu1 %v2258_v2 }
  0x2d   : > { %v2425_v4 = vld [vmem:[#allocation2] sm:$0xff]  ;;  %1909 = vmatpush3.bf16.msra.mxu0 %v2125_v3  ;;  %v447_v17 = vsub.s32 %v444_v15, %v2457_v16 }
  0x2e   : > { %v424_v5 = vpack.c.bf16 %v2425_v4, %v2425_v4  ;;  %1914 = vmatprep.subr.bf16.mxu0 %v2258_v2 }
  0x2f   : > { %1933 = vmatpush3.bf16.msra.mxu1 %v2130_v8  ;;  %v448_v19 = vrot.slane %v2461_v18, %v447_v17 }
  0x30   : > { %1911 = vmatmul.mubr.msk.bf16.vlgmr.msra.gmra.mxu0 %vm498_vm2, %v424_v5  ;;  %1944 = vmatprep.subr.bf16.mxu1 %v2258_v2 }
  0x31   : > { %1915 = vmatpush3.bf16.msra.mxu0 %v2126_v7  ;;  %1918 = vmatprep.mubr.msk.bf16.mxu0 %vm2259_vm1, %v2258_v2  ;;  %v456_v20 = vrot.slane %v448_v19, %v447_v17  ;;  %v449_v23 = vcombine.high %v448_v19, %v448_v19 }
  0x32   : > { %1916 = vmatprep.subr.bf16.mxu0 %v2258_v2  ;;  %1935 = vmatmul.mubr.msk.bf16.vlgmr.msra.gmra.mxu1 %vm498_vm2, %v424_v5 }
  0x33   : > { %1946 = vmatprep.mubr.msk.bf16.mxu1 %vm2259_vm1, %v2258_v2  ;;  %v469_v22 = vrot.slane %v456_v20, %v2465_v21  ;;  %v463_v26 = vrot.slane %v449_v23, %v447_v17  ;;  %v464_v37 = vcombine.high %v456_v20, %v456_v20 }
  0x35   : > { %1917 = vmatpush3.bf16.msra.mxu0 %v2127_v9  ;;  %v473_v30 = vrot.slane %v463_v26, %v2465_v21  ;;  %v465_v36 = vcombine.high %v463_v26, %v463_v26  ;;  %v477_v44 = vrot.slane %v464_v37, %v2465_v21 }
  0x36   : > { %1922 = vmatprep.subr.bf16.mxu0 %v2258_v2 }
  0x37   : > { %v481_v43 = vrot.slane %v465_v36, %v2465_v21 }
  0x38   : > { %1919 = vmatmul.mubr.msk.bf16.vlgmr.msra.gmra.mxu0 %vm498_vm2, %v424_v5 }
  0x39   : > { %1923 = vmatpush3.bf16.msra.mxu0 %v2129_v10  ;;  %1926 = vmatprep.mubr.msk.bf16.mxu0 %vm2259_vm1, %v2258_v2 }
  0x3a   : > { %1924 = vmatprep.subr.bf16.mxu0 %v2258_v2 }
  0x3d   : > { %1925 = vmatpush3.bf16.msra.mxu0 %v2131_v11 }
  0x3e   : > { %1938 = vmatprep.subr.bf16.mxu0 %v2258_v2 }
  0x40   : > { %1927 = vmatmul.mubr.msk.bf16.vlgmr.msra.gmra.mxu0 %vm498_vm2, %v424_v5 }
  0x41   : > { %1940 = vmatprep.mubr.msk.bf16.mxu0 %vm2259_vm1, %v2258_v2 }
  0xf0   : > { %v536_v24 = vpop.f32.mrf.mxu0 }
  0xf1   : > { %v537_v25 = vadd.f32 %v536_v24, %v469_v22 }
  0xf2   : > { %v1912_v27 = vpop.f32.mrf.mxu0  ;;  %v692_v31 = vpop.f32.mrf.mxu1 }
  0xf3   : > { %v2468_v28 = vpack.c.bf16 %v537_v25, %v537_v25  ;;  %v693_v47 = vadd.f32 %v692_v31, %v481_v43  ;;  %v698_v56 = vmul.f32 0.35355338, %v537_v25 }
  0xf4   : > { %v539_v29 = vpop.f32.mrf.mxu0  ;;  %v1936_v33 = vpop.f32.mrf.mxu1 }
  0xf5   : > { %711 = vrot.lane.b32.xlu0 %v2468_v28, %s2261_s27  ;;  %v2479_v52 = vpack.c.bf16 %v693_v47, %v693_v47  ;;  %v702_v57 = vpack.c.bf16 %v698_v56, %v698_v56  ;;  %v701_v5 = vmul.f32 0.35355338, %v693_v47 }
  0xf6   : > { %v1913_v32 = vpop.f32.mrf.mxu0  ;;  %v695_v38 = vpop.f32.mrf.mxu1 }
  0xf7   : > { %v705_v7 = vpack.c.bf16 %v701_v5, %v701_v5 }
  0xf8   : > { %v588_v34 = vpop.f32.mrf.mxu0  ;;  %v1937_v41 = vpop.f32.mrf.mxu1 }
  0xf9   : > { %v589_v35 = vadd.f32 %v588_v34, %v473_v30 }
  0xfa   : > { %v1920_v39 = vpop.f32.mrf.mxu0 }
  0xfb   : > { %v2472_v40 = vpack.c.bf16 %v589_v35, %v589_v35  ;;  %v699_v60 = vmul.f32 0.35355338, %v589_v35 }
  0xfc   : > { %v591_v42 = vpop.f32.mrf.mxu0 }
  0xfd   : > { %761 = vrot.lane.b32.xlu0 %v2472_v40, %s2261_s27  ;;  %v703_v61 = vpack.c.bf16 %v699_v60, %v699_v60 }
  0xfe   : > { %v1921_v45 = vpop.f32.mrf.mxu0 }
 0x100   : > { %v640_v46 = vpop.f32.mrf.mxu0 }
 0x101   : > { %v641_v48 = vadd.f32 %v640_v46, %v477_v44 }
 0x102   : > { %v1928_v49 = vpop.f32.mrf.mxu0 }
 0x103   : > { %v2477_v50 = vpack.c.bf16 %v641_v48, %v641_v48  ;;  %v700_v0 = vmul.f32 0.35355338, %v641_v48 }
 0x104   : > { %v643_v51 = vpop.f32.mrf.mxu0 }
 0x105   : > { %810 = vrot.lane.b32.xlu1 %v2477_v50, %s2261_s27  ;;  %v704_v6 = vpack.c.bf16 %v700_v0, %v700_v0 }
 0x106   : > { %v1929_v53 = vpop.f32.mrf.mxu0 }
 0x109   : > { %859 = vrot.lane.b32.xlu1 %v2479_v52, %s2261_s27 }
 0x167   : > { %v712_v54 = vpop.permute.xlu0 %711 }
 0x168   : > { %v718_v55 = vsel %vm713_vm3, %v712_v54, 0 }
 0x169   : > { %1939 = vmatpush3.bf16.xpose.msra.mxu0 %v718_v55 }
 0x16a   : > { %1950 = vmatprep.subr.bf16.mxu0 %v2258_v2 }
 0x16f   : > { %v762_v58 = vpop.permute.xlu0 %761 }
 0x170   : > { %v767_v59 = vsel %vm713_vm3, %v762_v58, 0  ;;  %1941 = vmatmul.mubr.msk.bf16.vlgmr.msra.gmra.mxu0 %vm713_vm3, %v702_v57 }
 0x171   : > { %1945 = vmatpush3.bf16.xpose.msra.mxu1 %v767_v59  ;;  %1952 = vmatprep.mubr.msk.bf16.mxu0 %vm2259_vm1, %v2258_v2 }
 0x172   : > { %1956 = vmatprep.subr.bf16.mxu1 %v2258_v2 }
 0x177   : > { %v811_v62 = vpop.permute.xlu1 %810 }
 0x178   : > { %v816_v63 = vsel %vm713_vm3, %v811_v62, 0  ;;  %1947 = vmatmul.mubr.msk.bf16.vlgmr.msra.gmra.mxu1 %vm713_vm3, %v703_v61 }
 0x179   : > { %1951 = vmatpush3.bf16.xpose.msra.mxu0 %v816_v63  ;;  %1958 = vmatprep.mubr.msk.bf16.mxu1 %vm2259_vm1, %v2258_v2 }
 0x17a   : > { %1962 = vmatprep.subr.bf16.mxu0 %v2258_v2 }
 0x17b   : > { %v860_v1 = vpop.permute.xlu1 %859 }
 0x17c   : > { %v865_v3 = vsel %vm713_vm3, %v860_v1, 0 }
 0x17d   : > { %1957 = vmatpush3.bf16.xpose.msra.mxu1 %v865_v3 }
 0x17e   : > { %1968 = vmatprep.subr.bf16.mxu1 %v2258_v2 }
 0x180   : > { %1953 = vmatmul.mubr.msk.bf16.vlgmr.msra.gmra.mxu0 %vm713_vm3, %v704_v6 }
 0x181   : > { %1964 = vmatprep.mubr.msk.bf16.mxu0 %vm2259_vm1, %v2258_v2 }
 0x184   : > { %1959 = vmatmul.mubr.msk.bf16.vlgmr.msra.gmra.mxu1 %vm713_vm3, %v705_v7 }
 0x185   : > { %1970 = vmatprep.mubr.msk.bf16.mxu1 %vm2259_vm1, %v2258_v2 }
 0x230   : > { %v754_v8 = vpop.f32.mrf.mxu0 }
 0x231   : > { %v907_v9 = vsel %vm713_vm3, %v754_v8, -inf }
 0x232   : > { %908 = vmax.xlane.f32.xlu0 %v907_v9  ;;  %v1942_v10 = vpop.f32.mrf.mxu0 }
 0x234   : > { %v757_v11 = vpop.f32.mrf.mxu0 }
 0x236   : > { %v1943_v12 = vpop.f32.mrf.mxu0 }
 0x238   : > { %v803_v13 = vpop.f32.mrf.mxu1 }
 0x239   : > { %v910_v14 = vsel %vm713_vm3, %v803_v13, -inf }
 0x23a   : > { %v1948_v15 = vpop.f32.mrf.mxu1  ;;  %911 = vmax.xlane.f32.xlu1 %v910_v14 }
 0x23b   : > { %v1153_v15 = vld [vmem:[%s2400_s22 + $0x4] sm:$0xf] }
 0x23c   : > { %v806_v17 = vpop.f32.mrf.mxu1 }
 0x23d   : > { %v1206_v17 = vsel %vm960_vm4, %v1153_v15, 0  ;;  %v2137_v15 = vld [vmem:[%s2410_s26 + $0x20] sm:$0xff]  }
 0x23e   : > { %v1949_v19 = vpop.f32.mrf.mxu1 }
 0x23f   : > { %v1154_v19 = vld [vmem:[%s2400_s22 + $0x8] sm:$0xf] }
 0x240   : > { %v852_v20 = vpop.f32.mrf.mxu0 }
 0x241   : > { %v913_v22 = vsel %vm713_vm3, %v852_v20, -inf }
 0x242   : > { %914 = vmax.xlane.f32.xlu0 %v913_v22  ;;  %v1954_v23 = vpop.f32.mrf.mxu0 }
 0x243   : > { %v1252_v23 = vsel %vm960_vm4, %v1154_v19, 0  ;;  %v2139_v19 = vld [vmem:[%s2410_s26 + $0x10] sm:$0xff]  }
 0x244   : > { %v855_v24 = vpop.f32.mrf.mxu0  ;;  %v901_v25 = vpop.f32.mrf.mxu1 }
 0x245   : > { %v916_v26 = vsel %vm713_vm3, %v901_v25, -inf }
 0x246   : > { %v1960_v27 = vpop.f32.mrf.mxu1  ;;  %917 = vmax.xlane.f32.xlu0 %v916_v26  ;;  %v1955_v29 = vpop.f32.mrf.mxu0 }
 0x247   : > { %v1155_v27 = vld [vmem:[%s2400_s22 + $0xc] sm:$0xf] }
 0x248   : > { %v904_v30 = vpop.f32.mrf.mxu1 }
 0x24a   : > { %v1961_v31 = vpop.f32.mrf.mxu1 }
 0x24b   : > { %955 = vrot.lane.b32.xlu1 %v2468_v28, %s2262_s29  ;;  %v1298_v31 = vsel %vm960_vm4, %v1155_v27, 0 }
 0x2bb   : > { %v909_v32 = vpop.xlane.xlu0 %908 }
 0x2bc   : > { %v919_v33 = vsub.f32 %v754_v8, %v909_v32 }
 0x2be   : > { %v923_v34 = vmul.f32 1.442695, %v919_v33 }
 0x2c0   : > { %2142 = vpow2.f32 %v923_v34 }
 0x2c3   : > { %v912_v35 = vpop.xlane.xlu1 %911 }
 0x2c4   : > { %v920_v36 = vsub.f32 %v803_v13, %v912_v35  ;;  %v1152_v13 = vld [vmem:[%s2400_s22] sm:$0xf] }
 0x2c5   : > { %v1160_v14 = vsel %vm960_vm4, %v1152_v13, 0  ;;  %v2135_v13 = vld [vmem:[%s2410_s26 + $0x30] sm:$0xff]  }
 0x2c6   : > { %v925_v37 = vmul.f32 1.442695, %v920_v36 }
 0x2c7   : > { %v956_v38 = vpop.permute.xlu1 %955 }
 0x2c8   : > { %2144 = vpow2.f32 %v925_v37  ;;  %v962_v39 = vsel %vm960_vm4, %v956_v38, 0 }
 0x2c9   : > { %1963 = vmatpush3.bf16.msra.mxu0 %v962_v39 }
 0x2ca   : > { %1974 = vmatprep.subr.bf16.mxu0 %v2258_v2 }
 0x2cb   : > { %v915_v41 = vpop.xlane.xlu0 %914 }
 0x2cc   : > { %v921_v42 = vsub.f32 %v852_v20, %v915_v41 }
 0x2cd   : > { %v2143_v43 = vpop.eup %2142 }
 0x2ce   : > { %v927_v44 = vmul.f32 1.442695, %v921_v42  ;;  %v931_v28 = vsel %vm713_vm3, %v2143_v43, 0.0 }
 0x2cf   : > { %932 = vadd.xlane.f32.xlu1 %v931_v28  ;;  %v918_v45 = vpop.xlane.xlu0 %917 }
 0x2d0   : > { %2146 = vpow2.f32 %v927_v44  ;;  %v922_v46 = vsub.f32 %v901_v25, %v918_v45 }
 0x2d2   : > { %v929_v47 = vmul.f32 1.442695, %v922_v46 }
 0x2d4   : > { %2148 = vpow2.f32 %v929_v47 }
 0x2d5   : > { %v2145_v48 = vpop.eup %2144 }
 0x2d6   : > { %v934_v49 = vsel %vm713_vm3, %v2145_v48, 0.0 }
 0x2d7   : > { %935 = vadd.xlane.f32.xlu0 %v934_v49 }
 0x2dd   : > { %v2147_v51 = vpop.eup %2146 }
 0x2de   : > { %v937_v53 = vsel %vm713_vm3, %v2147_v51, 0.0 }
 0x2df   : > { %938 = vadd.xlane.f32.xlu1 %v937_v53 }
 0x2e1   : > { %v2149_v54 = vpop.eup %2148 }
 0x2e2   : > { %v940_v55 = vsel %vm713_vm3, %v2149_v54, 0.0 }
 0x2e3   : > { %941 = vadd.xlane.f32.xlu0 %v940_v55 }
 0x2f0   : > { %1052 = vrot.lane.b32.xlu1 %v2477_v50, %s2262_s29 }
 0x2f4   : > { %1100 = vrot.lane.b32.xlu1 %v2479_v52, %s2262_s29 }
 0x2f9   : > { %1004 = vrot.lane.b32.xlu0 %v2472_v40, %s2262_s29 }
 0x358   : > { %v933_v56 = vpop.xlane.xlu1 %932 }
 0x359   : > { %2150 = vrcp.f32 %v933_v56 }
 0x360   : > { %v936_v57 = vpop.xlane.xlu0 %935 }
 0x361   : > { %2152 = vrcp.f32 %v936_v57 }
 0x366   : > { %v2151_v58 = vpop.eup %2150 }
 0x367   : > { %v947_v59 = vmul.f32 %v2151_v58, %v2143_v43 }
 0x368   : > { %v939_v60 = vpop.xlane.xlu1 %938 }
 0x369   : > { %2154 = vrcp.f32 %v939_v60  ;;  %v951_v61 = vpack.c.bf16 %v947_v59, %v947_v59 }
 0x36b   : > { %1965 = vmatmul.mubr.msk.bf16.vlgmr.msra.gmra.mxu0 %vm713_vm3, %v951_v61 }
 0x36c   : > { %v1053_v62 = vpop.permute.xlu1 %1052  ;;  %v942_v63 = vpop.xlane.xlu0 %941  ;;  %1976 = vmatprep.mubr.msk.bf16.mxu0 %vm2259_vm1, %v2258_v2 }
 0x36d   : > { %v1058_v50 = vsel %vm960_vm4, %v1053_v62, 0  ;;  %2156 = vrcp.f32 %v942_v63 }
 0x36e   : > { %v2153_v40 = vpop.eup %2152  ;;  %1975 = vmatpush3.bf16.msra.mxu0 %v1058_v50 }
 0x36f   : > { %v948_v52 = vmul.f32 %v2153_v40, %v2145_v48  ;;  %1986 = vmatprep.subr.bf16.mxu0 %v2258_v2 }
 0x370   : > { %v1005_v0 = vpop.permute.xlu0 %1004  ;;  %v1101_v3 = vpop.permute.xlu1 %1100 }
 0x371   : > { %v1010_v1 = vsel %vm960_vm4, %v1005_v0, 0  ;;  %v952_v5 = vpack.c.bf16 %v948_v52, %v948_v52  ;;  %v1106_v6 = vsel %vm960_vm4, %v1101_v3, 0 }
 0x372   : > { %1969 = vmatpush3.bf16.msra.mxu1 %v1010_v1 }
 0x373   : > { %1980 = vmatprep.subr.bf16.mxu1 %v2258_v2 }
 0x375   : > { %1971 = vmatmul.mubr.msk.bf16.vlgmr.msra.gmra.mxu1 %vm713_vm3, %v952_v5 }
 0x376   : > { %v2155_v7 = vpop.eup %2154  ;;  %1981 = vmatpush3.bf16.msra.mxu1 %v1106_v6  ;;  %1982 = vmatprep.mubr.msk.bf16.mxu1 %vm2259_vm1, %v2258_v2 }
 0x377   : > { %v949_v8 = vmul.f32 %v2155_v7, %v2147_v51  ;;  %1992 = vmatprep.subr.bf16.mxu1 %v2258_v2 }
 0x379   : > { %v953_v9 = vpack.c.bf16 %v949_v8, %v949_v8 }
 0x37a   : > { %v2157_v10 = vpop.eup %2156 }
 0x37b   : > { %1977 = vmatmul.mubr.msk.bf16.vlgmr.msra.gmra.mxu0 %vm713_vm3, %v953_v9  ;;  %v950_v11 = vmul.f32 %v2157_v10, %v2149_v54  ;;  %v1345_v54 = vsub.s32 4, %v2457_v16 }
 0x37c   : > { %1988 = vmatprep.mubr.msk.bf16.mxu0 %vm2259_vm1, %v2258_v2  ;;  %1987 = vmatpush3.bf16.msra.mxu0 %v1160_v14  ;;  %v2136_v14 = vld [vmem:[%s2410_s26 + $0x28] sm:$0xff]  }
 0x37d   : > { %v954_v12 = vpack.c.bf16 %v950_v11, %v950_v11  ;;  %1998 = vmatprep.subr.bf16.mxu0 %v2258_v2  ;;  %v1346_v60 = vrot.slane %v2461_v18, %v1345_v54  ;;  %v2132_v11 = vld [vmem:[%s2405_s24 + $0x8] sm:$0xff]  }
 0x37f   : > { %1983 = vmatmul.mubr.msk.bf16.vlgmr.msra.gmra.mxu1 %vm713_vm3, %v954_v12  ;;  %v2133_v12 = vld [vmem:[%s2405_s24] sm:$0xff]  }
 0x380   : > { %1994 = vmatprep.mubr.msk.bf16.mxu1 %vm2259_vm1, %v2258_v2  ;;  %1993 = vmatpush3.bf16.msra.mxu1 %v1206_v17  ;;  %v2138_v17 = vld [vmem:[%s2410_s26 + $0x18] sm:$0xff]  }
 0x381   : > { %2004 = vmatprep.subr.bf16.mxu1 %v2258_v2 }
 0x42b   : > { %v998_v20 = vpop.f32.mrf.mxu0 }
 0x42c   : > { %v1148_v22 = vpack.c.bf16 %v998_v20, %v998_v20 }
 0x42d   : > { %v1966_v24 = vpop.f32.mrf.mxu0 }
 0x42e   : > { %1989 = vmatmul.mubr.msk.bf16.vlgmr.msra.gmra.mxu0 %vm713_vm3, %v1148_v22  ;;  %v1365_v24 = vsub.s32 5, %v2457_v16 }
 0x42f   : > { %v1001_v25 = vpop.f32.mrf.mxu0  ;;  %1999 = vmatpush3.bf16.msra.mxu0 %v1252_v23  ;;  %2000 = vmatprep.mubr.msk.bf16.mxu0 %vm2259_vm1, %v2258_v2 }
 0x430   : > { %2010 = vmatprep.subr.bf16.mxu0 %v2258_v2  ;;  %v1370_v25 = vsub.s32 6, %v2457_v16 }
 0x431   : > { %v1967_v26 = vpop.f32.mrf.mxu0 }
 0x432   : > { %v1366_v26 = vrot.slane %v2461_v18, %v1365_v24 }
 0x435   : > { %v1046_v29 = vpop.f32.mrf.mxu1 }
 0x436   : > { %v1149_v30 = vpack.c.bf16 %v1046_v29, %v1046_v29 }
 0x437   : > { %v1972_v32 = vpop.f32.mrf.mxu1 }
 0x438   : > { %1995 = vmatmul.mubr.msk.bf16.vlgmr.msra.gmra.mxu1 %vm713_vm3, %v1149_v30  ;;  %v1371_v30 = vrot.slane %v2461_v18, %v1370_v25 }
 0x439   : > { %v1049_v33 = vpop.f32.mrf.mxu1  ;;  %2005 = vmatpush3.bf16.msra.mxu1 %v1298_v31  ;;  %2006 = vmatprep.mubr.msk.bf16.mxu1 %vm2259_vm1, %v2258_v2 }
 0x43a   : > { %2018 = vmatprep.subr.bf16.mxu1 %v2258_v2 }
 0x43b   : > { %v1973_v34 = vpop.f32.mrf.mxu1  ;;  %v1094_v35 = vpop.f32.mrf.mxu0 }
 0x43c   : > { %v1150_v36 = vpack.c.bf16 %v1094_v35, %v1094_v35  ;;  %v2140_v34 = vld [vmem:[%s2410_s26 + $0x8] sm:$0xff]   ;;  %v2141_v35 = vld [vmem:[%s2410_s26] sm:$0xff]  }
 0x43d   : > { %v1978_v37 = vpop.f32.mrf.mxu0 }
 0x43e   : > { %2001 = vmatmul.mubr.msk.bf16.vlgmr.msra.gmra.mxu0 %vm713_vm3, %v1150_v36  ;;  %v1380_v36 = vsub.s32 7, %v2457_v16 }
 0x43f   : > { %v1097_v38 = vpop.f32.mrf.mxu0  ;;  %v1142_v39 = vpop.f32.mrf.mxu1  ;;  %2014 = vmatprep.mubr.msk.bf16.mxu0 %vm2259_vm1, %v2258_v2  ;;  %2011 = vmatpush3.bf16.msra.mxu0 %v2132_v11 }
 0x440   : > { %v1151_v41 = vpack.c.bf16 %v1142_v39, %v1142_v39  ;;  %2012 = vmatprep.subr.bf16.mxu0 %v2258_v2  ;;  %v1381_v37 = vrot.slane %v2461_v18, %v1380_v36 }
 0x441   : > { %v1979_v42 = vpop.f32.mrf.mxu0  ;;  %v1984_v43 = vpop.f32.mrf.mxu1 }
 0x442   : > { %2007 = vmatmul.mubr.msk.bf16.vlgmr.msra.gmra.mxu1 %vm713_vm3, %v1151_v41 }
 0x443   : > { %v1145_v44 = vpop.f32.mrf.mxu1  ;;  %2034 = vmatprep.mubr.msk.bf16.mxu1 %vm2259_vm1, %v2258_v2  ;;  %2013 = vmatpush3.bf16.msra.mxu0 %v2133_v12 }
 0x445   : > { %v1985_v28 = vpop.f32.mrf.mxu1 }
 0x4ee   : > { %v1196_v45 = vpop.f32.mrf.mxu0 }
 0x4f0   : > { %v1990_v46 = vpop.f32.mrf.mxu0 }
 0x4f2   : > { %v1199_v47 = vpop.f32.mrf.mxu0 }
 0x4f4   : > { %v1991_v48 = vpop.f32.mrf.mxu0 }
 0x4f8   : > { %v1242_v49 = vpop.f32.mrf.mxu1 }
 0x4f9   : > { %v1340_v57 = vadd.f32 %v1242_v49, %v1196_v45  ;;  %v423_v45 = vld [vmem:[%s2415_s16 + $0x8] sm:$0xff] }
 0x4fa   : > { %v1996_v51 = vpop.f32.mrf.mxu1  ;;  %v1458_v46 = vrot.slane %v423_v45, %v2465_v21  ;;  %v1563_v21 = vsub.s32 1, %v2457_v16 }
 0x4fc   : > { %v1245_v53 = vpop.f32.mrf.mxu1 }
 0x4fe   : > { %v1997_v55 = vpop.f32.mrf.mxu1  ;;  %v1288_v56 = vpop.f32.mrf.mxu0 }
 0x4ff   : > { %v1341_v59 = vadd.f32 %v1340_v57, %v1288_v56 }
 0x500   : > { %v2002_v58 = vpop.f32.mrf.mxu0 }
 0x502   : > { %v1291_v61 = vpop.f32.mrf.mxu0  ;;  %v1334_v62 = vpop.f32.mrf.mxu1 }
 0x503   : > { %v1342_v63 = vadd.f32 %v1341_v59, %v1334_v62  ;;  %v1568_v62 = vsub.s32 2, %v2457_v16 }
 0x504   : > { %v2003_v50 = vpop.f32.mrf.mxu0  ;;  %v2008_v40 = vpop.f32.mrf.mxu1 }
 0x505   : > { %v1347_v52 = vadd.f32 %v1346_v60, %v1342_v63  ;;  %v1564_v63 = vrot.slane %v423_v45, %v1563_v21  ;;  %v1569_v40 = vrot.slane %v423_v45, %v1568_v62 }
 0x506   : > { %v1337_v0 = vpop.f32.mrf.mxu1 }
 0x507   : > { %v1348_v1 = vadd.f32 %v1347_v52, %v2425_v4  ;;  %v2134_v4 = vld [vmem:[%s2410_s26 + $0x38] sm:$0xff]  }
 0x508   : > { %v2009_v3 = vpop.f32.mrf.mxu1  ;;  %2019 = vmatpush3.bf16.msra.mxu1 %v2134_v4 }
 0x509   : > { %v1349_v5 = vsel %vm498_vm2, %v1348_v1, 0.0  ;;  %2020 = vmatprep.subr.bf16.mxu1 %v2258_v2 }
 0x50a   : > { %1350 = vadd.xlane.f32.xlu0 %v1349_v5 }
 0x50c   : > { %2021 = vmatpush3.bf16.msra.mxu1 %v2135_v13 }
 0x50d   : > { %2022 = vmatprep.subr.bf16.mxu1 %v2258_v2 }
 0x510   : > { %2023 = vmatpush3.bf16.msra.mxu1 %v2136_v14 }
 0x511   : > { %2024 = vmatprep.subr.bf16.mxu1 %v2258_v2 }
 0x514   : > { %2025 = vmatpush3.bf16.msra.mxu1 %v2137_v15 }
 0x515   : > { %2026 = vmatprep.subr.bf16.mxu1 %v2258_v2 }
 0x518   : > { %2027 = vmatpush3.bf16.msra.mxu1 %v2138_v17 }
 0x519   : > { %2028 = vmatprep.subr.bf16.mxu1 %v2258_v2 }
 0x51c   : > { %2029 = vmatpush3.bf16.msra.mxu1 %v2139_v19 }
 0x51d   : > { %2030 = vmatprep.subr.bf16.mxu1 %v2258_v2 }
 0x520   : > { %2031 = vmatpush3.bf16.msra.mxu1 %v2140_v34 }
 0x521   : > { %2032 = vmatprep.subr.bf16.mxu1 %v2258_v2 }
 0x524   : > { %2033 = vmatpush3.bf16.msra.mxu1 %v2141_v35 }
 0x593   : > { %v1351_v6 = vpop.xlane.xlu0 %1350 }
 0x594   : > { %v1353_v7 = vmul.f32 0.03125, %v1351_v6 }
 0x596   : > { %v1354_v8 = vsub.f32 %v1348_v1, %v1353_v7 }
 0x598   : > { %v1355_v9 = vmul.f32 %v1354_v8, %v1354_v8 }
 0x59a   : > { %v1356_v10 = vsel %vm498_vm2, %v1355_v9, 0.0 }
 0x59b   : > { %1357 = vadd.xlane.f32.xlu1 %v1356_v10 }
 0x624   : > { %v1358_v20 = vpop.xlane.xlu1 %1357 }
 0x625   : > { %v1359_v22 = vmul.f32 0.03125, %v1358_v20 }
 0x627   : > { %v1360_v23 = vadd.f32 1e-05, %v1359_v22 }
 0x629   : > { %2158 = vrsqrt.f32 %v1360_v23 }
 0x636   : > { %v2159_v27 = vpop.eup %2158 }
 0x637   : > { %v1362_v29 = vmul.f32 %v2159_v27, %v1354_v8 }
 0x639   : > { %v1367_v31 = vmul.f32 %v1366_v26, %v1362_v29 }
 0x63b   : > { %v1372_v32 = vadd.f32 %v1371_v30, %v1367_v31 }
 0x63d   : > { %v1373_v33 = vpack.c.bf16 %v1372_v32, %v1372_v32 }
 0x63f   : > { %2015 = vmatmul.mubr.msk.bf16.vlgmr.msra.gmra.mxu0 %vm498_vm2, %v1373_v33 }
 0x6ff   : > { %v1431_v38 = vpop.f32.mrf.mxu0 }
 0x700   : > { %v1432_v39 = vadd.f32 %v1431_v38, %v1381_v37 }
 0x701   : > { %v2016_v41 = vpop.f32.mrf.mxu0 }
 0x702   : > { %v1437_v42 = vmax.f32 %v1432_v39, 0.0 }
 0x703   : > { %v1434_v43 = vpop.f32.mrf.mxu0 }
 0x704   : > { %v1438_v44 = vpack.c.bf16 %v1437_v42, %v1437_v42 }
 0x705   : > { %v2017_v28 = vpop.f32.mrf.mxu0 }
 0x706   : > { %2035 = vmatmul.mubr.bf16.vlgmr.msra.gmra.mxu1 %v1438_v44 }
 0x7c6   : > { %v1541_v47 = vpop.f32.mrf.mxu1 }
 0x7c7   : > { %v1542_v48 = vadd.f32 %v1541_v47, %v1458_v46 }
 0x7c8   : > { %v2036_v2 = vpop.f32.mrf.mxu1 }
 0x7c9   : > { %v1547_v49 = vadd.f32 %v1542_v48, %v1372_v32 }
 0x7ca   : > { %v1544_v51 = vpop.f32.mrf.mxu1 }
 0x7cb   : > { %v1548_v53 = vsel %vm498_vm2, %v1547_v49, 0.0 }
 0x7cc   : > { %1549 = vadd.xlane.f32.xlu0 %v1548_v53  ;;  %v2037_v18 = vpop.f32.mrf.mxu1 }
 0x855   : > { %v1550_v54 = vpop.xlane.xlu0 %1549 }
 0x856   : > { %v1551_v55 = vmul.f32 0.03125, %v1550_v54 }
 0x858   : > { %v1552_v56 = vsub.f32 %v1547_v49, %v1551_v55 }
 0x85a   : > { %v1553_v57 = vmul.f32 %v1552_v56, %v1552_v56 }
 0x85c   : > { %v1554_v58 = vsel %vm498_vm2, %v1553_v57, 0.0 }
 0x85d   : > { %1555 = vadd.xlane.f32.xlu0 %v1554_v58 }
 0x8e6   : > { %v1556_v59 = vpop.xlane.xlu0 %1555 }
 0x8e7   : > { %v1557_v60 = vmul.f32 0.03125, %v1556_v59 }
 0x8e9   : > { %v1558_v61 = vadd.f32 1e-05, %v1557_v60 }
 0x8eb   : > { %2160 = vrsqrt.f32 %v1558_v61 }
 0x8f8   : > { %v2161_v50 = vpop.eup %2160 }
 0x8f9   : > { %v1560_v52 = vmul.f32 %v2161_v50, %v1552_v56 }
 0x8fb   : > { %v1565_v0 = vmul.f32 %v1564_v63, %v1560_v52  ;;  %1575 = sbr.rel (%p1841_p1) target bundleno = 2512 (0x9d0), region = 60 }
 0x8fd   : > { %v1570_v1 = vadd.f32 %v1569_v40, %v1565_v0 }
 0x8ff   : > { %1571 = vst.msk [vmem:[#allocation2] sm:$0xff] %vm498_vm2, %v1570_v1 }
 0x900   : > { %v2162_v3 = vld [vmem:[%s2667_s6 + $0x8] sm:$0xff]   ;;  %v2263_v5 = vmov 0.0   ;;  %v2163_v16 = vld [vmem:[%s2667_s6] sm:$0xff]   ;;  %vm2264_vm5 = vmmov 0   ;;  %v1576_v6 = vpack.c.bf16 %v1570_v1, %v1570_v1 }
 0x901   : > { %2038 = vmatprep.subr.bf16.mxu0 %v2263_v5  ;;  %2042 = vmatprep.mubr.msk.bf16.mxu0 %vm2264_vm5, %v2263_v5  ;;  %v1842_v7 = vld [vmem:[%s2668_s7] ss:$0 sm:$0xff] }
 0x902   : > { %2039 = vmatpush3.bf16.msra.mxu0 %v2162_v3 }
 0x903   : > { %2040 = vmatprep.subr.bf16.mxu0 %v2263_v5 }
 0x906   : > { %2041 = vmatpush3.bf16.msra.mxu0 %v2163_v16 }
 0x909   : > { %2043 = vmatmul.mubr.msk.bf16.vlgmr.msra.gmra.mxu0 %vm498_vm2, %v1576_v6 }
 0x9c9   : > { %v1637_v8 = vpop.f32.mrf.mxu0 }
 0x9ca   : > { %v1638_v9 = vadd.f32 %v1842_v7, %v1637_v8 }
 0x9cb   : > { %v2044_v10 = vpop.f32.mrf.mxu0 }
 0x9cc   : > { %1643 = vst [vmem:[%s383_s25] sm:$0xff] %v1638_v9 }
 0x9cd   : > { %v1640_v11 = vpop.f32.mrf.mxu0 }
 0x9cf   : > { %v2045_v12 = vpop.f32.mrf.mxu0 }
 0x9d0 PF: > { %s1847_s22 = sshll.u32 %s2244_s9, 7  ;;  %s1658_s13 = sshll.u32 %s383_s25, 4  ;;  %s1659_s13 = int_to_ptr.vmem [resolvable:$true] %s1658_s13 }
 0x9d1   : > { %s1656_s24 = scalar_lea.hbm %s2669_s8, %s1847_s22  ;;  %s2690_s26 = sand.u32 1, %s2232_s28  }
 0x9d2   : > { %s1645_s14 = scalar_lea.sflag [#allocation4], %s2690_s26  ;;  %s2164_s15 = scalar_lea.vmem %s1659_s13, 128 }
 0x9d3   : > { %p2165_p2 = scmp.ne.s32.totalorder %s1659_s13, %s2164_s15  ;;  %s2265_s16 = smov [#allocation3]  }
 0x9d4   : > { %s2168_s27 = sshll.u32 %s2265_s16, 4  ;;  %s2169_s27 = int_to_ptr.vmem [resolvable:$false] %s2168_s27 }
 0x9d5   : > { %p2166_p4 = pnand %p2165_p2, %p2360_p3  ;;  %s2170_s29 = scalar_lea.vmem %s2169_s27, 256 }
 0x9d6   : > { %p2171_p6 = scmp.lt.s32.totalorder %s1659_s13, %s2169_s27  ;;  %p2172_p7 = scmp.lt.s32.totalorder %s2170_s29, %s2164_s15 }
 0x9d7   : > { %p2167_p5 = pneg %p2166_p4 }
 0x9d8   : > { %p2173_p8 = por %p2172_p7, %p2171_p6 }
 0x9da   : > { %p2174_p10 = pnand %p2173_p8, %p2167_p5 }
 0x9dc   : > { %2177 = shalt.err (!%p2174_p10)
}
 0x9dd   : > { %s2178_s9 = scalar_lea.hbm %s1656_s24, 128  ;;  %s2182_s10 = scalar_lea.hbm %s2669_s8, 256 }
 0x9de   : > { %p2179_p11 = scmp.ne.s32.totalorder %s1656_s24, %s2178_s9  ;;  %p2183_p0 = scmp.lt.s32.totalorder %s1656_s24, %s2669_s8 }
 0x9df   : > { %p2184_p1 = scmp.lt.s32.totalorder %s2182_s10, %s2178_s9 }
 0x9e0   : > { %p2180_p12 = pnand %p2179_p11, %p2360_p3 }
 0x9e1   : > { %p2185_p2 = por %p2184_p1, %p2183_p0 }
 0x9e2   : > { %p2181_p13 = pneg %p2180_p12 }
 0x9e4   : > { %p2186_p4 = pnand %p2185_p2, %p2181_p13 }
 0x9e6   : > { %2189 = shalt.err (!%p2186_p4)
}
 0x9e7   : > { %2046 = dma.vmem_to_hbm [thread:$0]  (%p2360_p3), %s1659_s13, 128, %s1656_s24, %s1645_s14  }
 0x9e8 PF: > { %s2691_s18 = sld [smem:[#allocation10_spill]] }
 0x9e9   : > { %s2692_s30 = sld [smem:[#allocation6_spill]] }
 0x9ee   : > { %p2052_p5 = scmp.ge.s32.totalorder %s2691_s18, 2 }
 0x9ef   : > { %s1670_s22 = sand.u32 1, %s2692_s30  }
 0x9f0   : > { %p2049_p6 = pnand %p2052_p5, %p2370_p9  ;;  %s1671_s19 = scalar_lea.sflag [#allocation4], %s1670_s22 }
 0x9f2   : > { %p2050_p7 = pneg %p2049_p6 }
 0x9f4   : > { %2223 = dma.done.wait (%p2050_p7), %s1671_s19, 128  }
 0x9f5   : > { %2225 = vsyncadd (%p2050_p7), %s1671_s19, 4294967168  ;;  %s21_s12 = sadd.s32 1, %s2691_s18   ;;  %s2694_s20 = sld [smem:[#allocation7_spill]] }
 0x9f6   : > { %p18_p8 = scmp.ge.s32.totalorder %s21_s12, 6   ;;  %s2695_s29 = sld [smem:[#allocation14_spill]] }
 0x9f7   : > { %s2696_s30 = sld [smem:[#allocation8_spill]]  ;;  %s2700_s27 = smov %s2232_s28 }
 0x9f8   : > { %s2697_s9 = sld [smem:[#allocation9_spill]]  ;;  %20 = sbr.rel (!%p18_p8) target bundleno = 5 (0x5), region = 110 }
 0x9f9   : > { %s2698_s10 = sld [smem:[#allocation11_spill]] }
 0x9fa   : > { %s2699_s11 = sld [smem:[#allocation12_spill]] }
 0x9fb   : > { %s2701_s28 = smov %s2694_s20 }
 0x9fd   :  { %1676 = vsyncpa [#allocation4], 1 }
 0x9fe   :  { %1678 = vsyncpa [#allocation4 + $0x1], 1 }

</bundles_post_ra>
